<compile_context>
chip_gen: v5e
topology: v5e:2x2
jax: 0.10.0
libtpu: 0.0.40
codegen_flags: <defaults>
</compile_context>

<pallas_src>
import functools

import jax
import jax.numpy as jnp
from jax.experimental import pallas as pl
from jax.experimental.pallas import tpu as pltpu


def _residual_mlp_kernel(x_ref, w1_ref, b1_ref, w2_ref, b2_ref, o_ref, *, h_chunk):
    # x_ref: (TM, D)  w1: (D, H)  b1: (1, H)  w2: (H, D)  b2: (1, D)  o: (TM, D)
    x = x_ref[...]
    # f32 accumulator seeded with the residual (ResidualAdd semantics) + bias2.
    acc = x.astype(jnp.float32) + b2_ref[...].astype(jnp.float32)

    hidden = w1_ref.shape[1]
    # Chunk the hidden dimension so the (TM, H) intermediate never exceeds
    # (TM, h_chunk) f32 in VMEM; static Python loop -> static ref slices.
    for lo in range(0, hidden, h_chunk):
        hi = min(lo + h_chunk, hidden)
        h = jnp.dot(x, w1_ref[:, lo:hi], preferred_element_type=jnp.float32)
        h = h + b1_ref[:, lo:hi].astype(jnp.float32)
        h = jax.nn.gelu(h, approximate=True)          # tanh GELU, f32, on EUP
        # Deliberate cast to the weight dtype (bf16 path feeds the MXU bf16);
        # accumulation stays f32 via preferred_element_type.
        acc = acc + jnp.dot(h.astype(w2_ref.dtype), w2_ref[lo:hi, :],
                            preferred_element_type=jnp.float32)

    o_ref[...] = acc.astype(o_ref.dtype)


def residual_add_mlp(x, w1, b1, w2, b2, *, tile_m=256, h_chunk=1024):
    """out = MLP(x) + x, fused in one Pallas kernel.

    x: (B, S, D) -> (B, S, D), same dtype as x.
    w1: (D, H), b1: (H,), w2: (H, D), b2: (D,).
    """
    B, S, D = x.shape
    H = w1.shape[1]
    N = B * S

    x2d = x.reshape(N, D)
    b1_2d = b1.reshape(1, H)
    b2_2d = b2.reshape(1, D)

    # Row tile: either the full extent, or a multiple of 16 sublanes
    # (legal block shape for both f32 and bf16 packing).
    if N <= tile_m:
        tm = N
    else:
        tm = max(16, (tile_m // 16) * 16)
    grid = (pl.cdiv(N, tm),)
    h_chunk_eff = max(1, min(h_chunk, H))

    # Advisory cost estimate for XLA's scheduler around the custom call.
    act_bytes = jnp.dtype(x.dtype).itemsize
    w_bytes = jnp.dtype(w1.dtype).itemsize
    cost = pl.CostEstimate(
        flops=int(4 * N * D * H),                 # two matmuls, 2*N*D*H each
        transcendentals=int(N * H),               # one tanh per hidden element
        bytes_accessed=int(2 * N * D * act_bytes  # x in + out
                           + (D * H + H * D + H + D) * w_bytes),
    )

    kernel = functools.partial(_residual_mlp_kernel, h_chunk=h_chunk_eff)

    out2d = pl.pallas_call(
        kernel,
        out_shape=jax.ShapeDtypeStruct((N, D), x.dtype),
        grid_spec=pltpu.PrefetchScalarGridSpec(
            num_scalar_prefetch=0,
            grid=grid,
            in_specs=[
                pl.BlockSpec((tm, D), lambda i: (i, 0)),   # x: streamed row tiles
                pl.BlockSpec((D, H), lambda i: (0, 0)),    # w1: VMEM-resident
                pl.BlockSpec((1, H), lambda i: (0, 0)),    # b1
                pl.BlockSpec((H, D), lambda i: (0, 0)),    # w2
                pl.BlockSpec((1, D), lambda i: (0, 0)),    # b2
            ],
            out_specs=pl.BlockSpec((tm, D), lambda i: (i, 0)),
        ),
        compiler_params=pltpu.CompilerParams(
            dimension_semantics=("parallel",),             # megacore-shardable
            vmem_limit_bytes=64 * 1024 * 1024,
        ),
        cost_estimate=cost,
    )(x2d, w1, b1_2d, w2, b2_2d)
    return out2d.reshape(B, S, D)


def _reference(x, w1, b1, w2, b2):
    x2 = x.reshape(-1, x.shape[-1]).astype(jnp.float32)
    y = jax.nn.gelu(x2 @ w1.astype(jnp.float32) + b1.astype(jnp.float32),
                    approximate=True)
    y = y @ w2.astype(jnp.float32) + b2.astype(jnp.float32) + x2
    return y.reshape(x.shape)


if __name__ == "__main__":
    # Small ViT-ish shapes: batch=2, tokens=512, hidden=32, MLP expansion 4x.
    B, S, D, H = 2, 512, 32, 128
    key = jax.random.PRNGKey(0)
    kx, k1, k2, k3, k4 = jax.random.split(key, 5)

    x = jax.random.normal(kx, (B, S, D), dtype=jnp.float32)
    w1 = jax.random.normal(k1, (D, H), dtype=jnp.float32) * 0.02
    b1 = jax.random.normal(k2, (H,), dtype=jnp.float32) * 0.02
    w2 = jax.random.normal(k3, (H, D), dtype=jnp.float32) * 0.02
    b2 = jax.random.normal(k4, (D,), dtype=jnp.float32) * 0.02

    ref = _reference(x, w1, b1, w2, b2)

    # f32 path (tight check): grid=(4,) row tiles of 256 tokens.
    out = jax.block_until_ready(residual_add_mlp(x, w1, b1, w2, b2, tile_m=256))
    assert jnp.allclose(out, ref, atol=5e-4, rtol=5e-4), "f32 mismatch vs reference"

    # bf16 path (MXU-native operands, f32 accumulation) — loose check.
    xb, w1b, b1b, w2b, b2b = (a.astype(jnp.bfloat16) for a in (x, w1, b1, w2, b2))
    out_bf = jax.block_until_ready(residual_add_mlp(xb, w1b, b1b, w2b, b2b, tile_m=256))
    assert jnp.allclose(out_bf.astype(jnp.float32), ref, atol=5e-2, rtol=5e-2), \
        "bf16 mismatch vs reference"

    print("KERNEL_OK")
</pallas_src>

<mosaic_0001>
module attributes {stable_mosaic.version = 11 : i64} {
  func.func @_residual_mlp_kernel(%arg0: i32, %arg1: memref<256x32xf32, #tpu.memory_space<vmem>>, %arg2: memref<32x128xf32, #tpu.memory_space<vmem>>, %arg3: memref<1x128xf32, #tpu.memory_space<vmem>>, %arg4: memref<128x32xf32, #tpu.memory_space<vmem>>, %arg5: memref<1x32xf32, #tpu.memory_space<vmem>>, %arg6: memref<256x32xf32, #tpu.memory_space<vmem>>) attributes {dimension_semantics = [#tpu.dimension_semantics<parallel>], iteration_bounds = array<i64: 4>, scalar_prefetch = 0 : i64, scratch_operands = 0 : i64, tpu.core_type = #tpu.core_type<tc>, window_params = [{transform_indices = @transform_0, window_bounds = array<i64: 256, 32>}, {pipeline_mode = #tpu.pipeline_mode<synchronous>, transform_indices = @transform_1, window_bounds = array<i64: 32, 128>}, {pipeline_mode = #tpu.pipeline_mode<synchronous>, transform_indices = @transform_2, window_bounds = array<i64: 1, 128>}, {pipeline_mode = #tpu.pipeline_mode<synchronous>, transform_indices = @transform_3, window_bounds = array<i64: 128, 32>}, {pipeline_mode = #tpu.pipeline_mode<synchronous>, transform_indices = @transform_4, window_bounds = array<i64: 1, 32>}, {transform_indices = @transform_5, window_bounds = array<i64: 256, 32>}]} {
    %c0 = arith.constant 0 : index
    %c0_0 = arith.constant 0 : index
    %0 = vector.load %arg1[%c0, %c0_0] : memref<256x32xf32, #tpu.memory_space<vmem>>, vector<256x32xf32>
    %c0_1 = arith.constant 0 : index
    %c0_2 = arith.constant 0 : index
    %1 = vector.load %arg5[%c0_1, %c0_2] : memref<1x32xf32, #tpu.memory_space<vmem>>, vector<1x32xf32>
    %2 = vector.broadcast %1 : vector<1x32xf32> to vector<256x32xf32>
    %3 = arith.addf %0, %2 : vector<256x32xf32>
    %c0_3 = arith.constant 0 : index
    %c0_4 = arith.constant 0 : index
    %4 = vector.load %arg2[%c0_3, %c0_4] : memref<32x128xf32, #tpu.memory_space<vmem>>, vector<32x128xf32>
    %cst = arith.constant dense<0.000000e+00> : vector<256x128xf32>
    %5 = tpu.matmul %0, %4, %cst {dimension_numbers = #tpu.dot_dimension_numbers<[1], [0], [0], [1], [0, 0, 1, 1], [], []>} : vector<256x32xf32>, vector<32x128xf32>, vector<256x128xf32> -> vector<256x128xf32>
    %c0_5 = arith.constant 0 : index
    %c0_6 = arith.constant 0 : index
    %6 = vector.load %arg3[%c0_5, %c0_6] : memref<1x128xf32, #tpu.memory_space<vmem>>, vector<1x128xf32>
    %7 = vector.broadcast %6 : vector<1x128xf32> to vector<256x128xf32>
    %8 = arith.addf %5, %7 : vector<256x128xf32>
    %9 = arith.mulf %8, %8 : vector<256x128xf32>
    %10 = arith.mulf %8, %9 : vector<256x128xf32>
    %cst_7 = arith.constant 4.471500e-02 : f32
    %11 = vector.broadcast %cst_7 : f32 to vector<256x128xf32>
    %12 = arith.mulf %11, %10 : vector<256x128xf32>
    %13 = arith.addf %8, %12 : vector<256x128xf32>
    %cst_8 = arith.constant 0.797884583 : f32
    %14 = vector.broadcast %cst_8 : f32 to vector<256x128xf32>
    %15 = arith.mulf %14, %13 : vector<256x128xf32>
    %16 = math.tanh %15 : vector<256x128xf32>
    %cst_9 = arith.constant 1.000000e+00 : f32
    %17 = vector.broadcast %cst_9 : f32 to vector<256x128xf32>
    %18 = arith.addf %17, %16 : vector<256x128xf32>
    %cst_10 = arith.constant 5.000000e-01 : f32
    %19 = vector.broadcast %cst_10 : f32 to vector<256x128xf32>
    %20 = arith.mulf %19, %18 : vector<256x128xf32>
    %21 = arith.mulf %8, %20 : vector<256x128xf32>
    %c0_11 = arith.constant 0 : index
    %c0_12 = arith.constant 0 : index
    %22 = vector.load %arg4[%c0_11, %c0_12] : memref<128x32xf32, #tpu.memory_space<vmem>>, vector<128x32xf32>
    %cst_13 = arith.constant dense<0.000000e+00> : vector<256x32xf32>
    %23 = tpu.matmul %21, %22, %cst_13 {dimension_numbers = #tpu.dot_dimension_numbers<[1], [0], [0], [1], [0, 0, 1, 1], [], []>} : vector<256x128xf32>, vector<128x32xf32>, vector<256x32xf32> -> vector<256x32xf32>
    %24 = arith.addf %3, %23 : vector<256x32xf32>
    %c0_14 = arith.constant 0 : index
    %c0_15 = arith.constant 0 : index
    %25 = vector.load %arg6[%c0_14, %c0_15] : memref<256x32xf32, #tpu.memory_space<vmem>>, vector<256x32xf32>
    tpu.vector_store %arg6[%c0_14, %c0_15], %24 {strides = array<i32>} : memref<256x32xf32, #tpu.memory_space<vmem>>, vector<256x32xf32>,
    return
  }
  func.func @transform_0(%arg0: i32) -> (i32, i32) {
    %c0_i32 = arith.constant 0 : i32
    %c0_i32_0 = arith.constant 0 : i32
    return %arg0, %c0_i32 : i32, i32
  }
  func.func @transform_1(%arg0: i32) -> (i32, i32) {
    %c0_i32 = arith.constant 0 : i32
    %c0_i32_0 = arith.constant 0 : i32
    %c0_i32_1 = arith.constant 0 : i32
    return %c0_i32, %c0_i32_0 : i32, i32
  }
  func.func @transform_2(%arg0: i32) -> (i32, i32) {
    %c0_i32 = arith.constant 0 : i32
    %c0_i32_0 = arith.constant 0 : i32
    %c0_i32_1 = arith.constant 0 : i32
    return %c0_i32, %c0_i32_0 : i32, i32
  }
  func.func @transform_3(%arg0: i32) -> (i32, i32) {
    %c0_i32 = arith.constant 0 : i32
    %c0_i32_0 = arith.constant 0 : i32
    %c0_i32_1 = arith.constant 0 : i32
    return %c0_i32, %c0_i32_0 : i32, i32
  }
  func.func @transform_4(%arg0: i32) -> (i32, i32) {
    %c0_i32 = arith.constant 0 : i32
    %c0_i32_0 = arith.constant 0 : i32
    %c0_i32_1 = arith.constant 0 : i32
    return %c0_i32, %c0_i32_0 : i32, i32
  }
  func.func @transform_5(%arg0: i32) -> (i32, i32) {
    %c0_i32 = arith.constant 0 : i32
    %c0_i32_0 = arith.constant 0 : i32
    return %arg0, %c0_i32 : i32, i32
  }
}

</mosaic_0001>

<bundles_post_ra>
// kernel: tpu_custom_call.1
= control target key start
LH: loop header
LB: loop body
LE: loop exit
PB: predicated region body
PF: predicated region fallthrough
CT: control target
= control target key end

     0   :  { %s1260_s18 = smov 0   ;;  %s1758_s0 = inlined_call_operand.vmem [shape: f32[1024,32], index: 0, kind: input, shape index: {}]   ;;  %s1759_s1 = inlined_call_operand.vmem [shape: f32[32,128], index: 1, kind: input, shape index: {}]   ;;  %s1760_s2 = inlined_call_operand.vmem [shape: f32[1,128], index: 2, kind: input, shape index: {}]   ;;  %s1761_s3 = inlined_call_operand.vmem [shape: f32[128,32], index: 3, kind: input, shape index: {}]   ;;  %s1762_s4 = inlined_call_operand.vmem [shape: f32[1,32], index: 4, kind: input, shape index: {}]   ;;  %s1763_s5 = inlined_call_operand.vmem [shape: f32[1024,32], index: 5, kind: output, shape index: {}]  }
   0x1 LB: > { %s1051_s19 = sadd.s32 4294967295, %s1228_s18   ;;  %p1055_p0 = scmp.ge.s32.totalorder %s1228_s18, 1  ;;  %s1228_s18 = sphi %s1260_s18, %s15_s18  }
   0x2   : > { %p188_p1 = scmp.lt.s32.totalorder %s1228_s18, 5 }
   0x4   : > { %p189_p2 = pnand %p1055_p0, %p188_p1 }
   0x5   : > { %s1056_s24 = sshll.u32 (!%p189_p2), %s1051_s19, 5 }
   0x6   : > { %192 = sbr.rel (%p189_p2) target bundleno = 537 (0x219), region = 40  ;;  %p217_p3 = scmp.lt.s32.totalorder (!%p189_p2), %s1056_s24, 127 }
   0xb   : > { %v299_v0 = vld [vmem:[%s1759_s1 + $0x18] sm:$0xff]  ;;  %v298_v1 = vld [vmem:[%s1759_s1 + $0x10] sm:$0xff]  ;;  %v297_v2 = vld [vmem:[%s1759_s1 + $0x8] sm:$0xff]  ;;  %s1765_s24 = smov (!%p217_p3, %s1056_s24), 127  ;;  %vm304_vm0 = vcmask 261120  }
   0xc   : > { %413 = vmatpush.msra.mxu0 %v299_v0  ;;  %1094 = vmatpush.msra.mxu3 %v299_v0  ;;  %v296_v3 = vld [vmem:[%s1759_s1] sm:$0xff]  ;;  %s1057_s29 = sshll.u32 %s1765_s24, 3  ;;  %v817_v19 = vld [vmem:[%s1761_s3 + $0x78] sm:$0xff]  ;;  %v816_v20 = vld [vmem:[%s1761_s3 + $0x70] sm:$0xff] }
   0xd   : > { %s1288_s7 = scalar_lea.vmem %s1758_s0, %s1057_s29  ;;  %818 = vmatpush.msra.mxu1 %v817_v19  ;;  %v815_v21 = vld [vmem:[%s1761_s3 + $0x68] sm:$0xff]  ;;  %1098 = vmatpush.msra.mxu2 %v817_v19  ;;  %v814_v24 = vld [vmem:[%s1761_s3 + $0x60] sm:$0xff]  ;;  %v813_v25 = vld [vmem:[%s1761_s3 + $0x58] sm:$0xff]  ;;  %s1521_s27 = scalar_lea.vmem %s1763_s5, %s1057_s29 }
   0xe   : > { %414 = vmatpush.msra.mxu0 %v298_v1  ;;  %1095 = vmatpush.msra.mxu3 %v298_v1  ;;  %v1291_v4 = vld [vmem:[%s1288_s7] sm:$0xff]  ;;  %v1296_v5 = vld [vmem:[%s1288_s7 + $0x8] sm:$0xff]  ;;  %v1301_v6 = vld [vmem:[%s1288_s7 + $0x10] sm:$0xff] }
   0xf   : > { %v1306_v7 = vld [vmem:[%s1288_s7 + $0x18] sm:$0xff]  ;;  %v1311_v8 = vld [vmem:[%s1288_s7 + $0x20] sm:$0xff]  ;;  %v1316_v9 = vld [vmem:[%s1288_s7 + $0x28] sm:$0xff]  ;;  %819 = vmatpush.msra.mxu1 %v816_v20  ;;  %1100 = vmatpush.msra.mxu2 %v816_v20 }
  0x10   : > { %415 = vmatpush.msra.mxu0 %v297_v2  ;;  %1096 = vmatpush.msra.mxu3 %v297_v2  ;;  %v1321_v10 = vld [vmem:[%s1288_s7 + $0x30] sm:$0xff]  ;;  %v1326_v11 = vld [vmem:[%s1288_s7 + $0x38] sm:$0xff]  ;;  %v236_v12 = vld [vmem:[%s1288_s7 + $0x40] sm:$0xff] }
  0x11   : > { %v246_v13 = vld [vmem:[%s1288_s7 + $0x90] sm:$0xff]  ;;  %v237_v14 = vld [vmem:[%s1288_s7 + $0x48] sm:$0xff]  ;;  %v247_v15 = vld [vmem:[%s1288_s7 + $0x98] sm:$0xff]  ;;  %820 = vmatpush.msra.mxu1 %v815_v21  ;;  %1102 = vmatpush.msra.mxu2 %v815_v21 }
  0x12   : > { %416 = vmatpush.msra.mxu0 %v296_v3  ;;  %1097 = vmatpush.msra.mxu3 %v296_v3  ;;  %v238_v16 = vld [vmem:[%s1288_s7 + $0x50] sm:$0xff]  ;;  %v248_v17 = vld [vmem:[%s1288_s7 + $0xa0] sm:$0xff]  ;;  %v239_v18 = vld [vmem:[%s1288_s7 + $0x58] sm:$0xff] }
  0x13   : > { %1060 = vmatmul.msk.f32.vlgmr.msra.gmra.mxu0 %vm304_vm0, %v1291_v4  ;;  %1078 = vmatmul.msk.f32.vlgmr.msra.gmra.mxu3 %vm304_vm0, %v246_v13  ;;  %v249_v22 = vld [vmem:[%s1288_s7 + $0xa8] sm:$0xff]  ;;  %v240_v23 = vld [vmem:[%s1288_s7 + $0x60] sm:$0xff]  ;;  %v812_v26 = vld [vmem:[%s1761_s3 + $0x50] sm:$0xff] }
  0x14   : > { %1099 = vmatpush.msrb.mxu3 %v817_v19  ;;  %821 = vmatpush.msra.mxu1 %v814_v24  ;;  %v811_v27 = vld [vmem:[%s1761_s3 + $0x48] sm:$0xff]  ;;  %v250_v28 = vld [vmem:[%s1288_s7 + $0xb0] sm:$0xff]  ;;  %v810_v30 = vld [vmem:[%s1761_s3 + $0x40] sm:$0xff] }
  0x15   : > { %1104 = vmatpush.msra.mxu2 %v814_v24  ;;  %v241_v29 = vld [vmem:[%s1288_s7 + $0x68] sm:$0xff]  ;;  %v809_v31 = vld [vmem:[%s1761_s3 + $0x38] sm:$0xff]  ;;  %v808_v32 = vld [vmem:[%s1761_s3 + $0x30] sm:$0xff] }
  0x16   : > { %1101 = vmatpush.msrb.mxu3 %v816_v20  ;;  %822 = vmatpush.msra.mxu1 %v813_v25  ;;  %v807_v33 = vld [vmem:[%s1761_s3 + $0x28] sm:$0xff]  ;;  %v251_v34 = vld [vmem:[%s1288_s7 + $0xb8] sm:$0xff]  ;;  %v242_v35 = vld [vmem:[%s1288_s7 + $0x70] sm:$0xff] }
  0x17   : > { %1106 = vmatpush.msra.mxu2 %v813_v25  ;;  %v806_v36 = vld [vmem:[%s1761_s3 + $0x20] sm:$0xff]  ;;  %v805_v37 = vld [vmem:[%s1761_s3 + $0x18] sm:$0xff]  ;;  %v804_v38 = vld [vmem:[%s1761_s3 + $0x10] sm:$0xff] }
  0x18   : > { %1103 = vmatpush.msrb.mxu3 %v815_v21  ;;  %823 = vmatpush.msra.mxu1 %v812_v26  ;;  %v803_v39 = vld [vmem:[%s1761_s3 + $0x8] sm:$0xff]  ;;  %v252_v40 = vld [vmem:[%s1288_s7 + $0xc0] sm:$0xff]  ;;  %v1403_v41 = vld [vmem:[%s1288_s7 + $0x78] sm:$0xff] }
  0x19   : > { %1108 = vmatpush.msra.mxu2 %v812_v26  ;;  %v802_v42 = vld [vmem:[%s1761_s3] sm:$0xff]  ;;  %v253_v44 = vld [vmem:[%s1288_s7 + $0xc8] sm:$0xff]  ;;  %v254_v51 = vld [vmem:[%s1288_s7 + $0xd0] sm:$0xff] }
  0x1a   : > { %1105 = vmatpush.msrb.mxu3 %v814_v24  ;;  %824 = vmatpush.msra.mxu1 %v811_v27  ;;  %v1414_v43 = vld [vmem:[%s1760_s2] ss:$0 sm:$0xff]  ;;  %v1426_v53 = vld [vmem:[%s1288_s7 + $0x88] sm:$0xff]  ;;  %v255_v60 = vld [vmem:[%s1288_s7 + $0xd8] sm:$0xff] }
  0x1b   : > { %1061 = vmatmul.msk.f32.gmra.mxu0 %vm304_vm0, %v1296_v5  ;;  %1079 = vmatmul.msk.f32.gmra.mxu3 %vm304_vm0, %v247_v15  ;;  %v1418_v46 = vld [vmem:[%s1288_s7 + $0x80] sm:$0xff] }
  0x1c   : > { %1107 = vmatpush.msrb.mxu3 %v813_v25  ;;  %1110 = vmatpush.msra.mxu2 %v811_v27  ;;  %v256_v15 = vld [vmem:[%s1288_s7 + $0xe0] sm:$0xff] }
  0x1d   : > { %825 = vmatpush.msra.mxu1 %v810_v30 }
  0x1e   : > { %1109 = vmatpush.msrb.mxu3 %v812_v26  ;;  %1112 = vmatpush.msra.mxu2 %v810_v30 }
  0x1f   : > { %826 = vmatpush.msra.mxu1 %v809_v31 }
  0x20   : > { %1114 = vmatpush.msra.mxu2 %v809_v31  ;;  %1111 = vmatpush.msrb.mxu3 %v811_v27  ;;  %v1439_v27 = vld [vmem:[%s1288_s7 + $0xe8] sm:$0xff] }
  0x21   : > { %827 = vmatpush.msra.mxu1 %v808_v32 }
  0x22   : > { %1116 = vmatpush.msra.mxu2 %v808_v32  ;;  %1113 = vmatpush.msrb.mxu3 %v810_v30 }
  0x23   : > { %1062 = vmatmul.msk.f32.gmra.mxu0 %vm304_vm0, %v1301_v6  ;;  %1080 = vmatmul.msk.f32.gmra.mxu3 %vm304_vm0, %v248_v17 }
  0x24   : > { %828 = vmatpush.msra.mxu1 %v807_v33  ;;  %1118 = vmatpush.msra.mxu2 %v807_v33 }
  0x25   : > { %1115 = vmatpush.msrb.mxu3 %v809_v31 }
  0x26   : > { %829 = vmatpush.msra.mxu1 %v806_v36  ;;  %1120 = vmatpush.msra.mxu2 %v806_v36 }
  0x27   : > { %1117 = vmatpush.msrb.mxu3 %v808_v32 }
  0x28   : > { %830 = vmatpush.msra.mxu1 %v805_v37  ;;  %1122 = vmatpush.msra.mxu2 %v805_v37 }
  0x29   : > { %1119 = vmatpush.msrb.mxu3 %v807_v33 }
  0x2a   : > { %831 = vmatpush.msra.mxu1 %v804_v38  ;;  %1124 = vmatpush.msra.mxu2 %v804_v38 }
  0x2b   : > { %1063 = vmatmul.msk.f32.gmra.mxu0 %vm304_vm0, %v1306_v7  ;;  %1081 = vmatmul.msk.f32.gmra.mxu3 %vm304_vm0, %v249_v22 }
  0x2c   : > { %832 = vmatpush.msra.mxu1 %v803_v39  ;;  %1126 = vmatpush.msra.mxu2 %v803_v39 }
  0x2d   : > { %1121 = vmatpush.msrb.mxu3 %v806_v36 }
  0x2e   : > { %833 = vmatpush.msra.mxu1 %v802_v42  ;;  %1128 = vmatpush.msra.mxu2 %v802_v42 }
  0x2f   : > { %1123 = vmatpush.msrb.mxu3 %v805_v37 }
  0x31   : > { %1125 = vmatpush.msrb.mxu3 %v804_v38 }
  0x33   : > { %1064 = vmatmul.msk.f32.gmra.mxu0 %vm304_vm0, %v1311_v8  ;;  %1082 = vmatmul.msk.f32.gmra.mxu3 %vm304_vm0, %v250_v28 }
  0x34   : > { %1127 = vmatpush.msrb.mxu3 %v803_v39  ;;  %v1445_v39 = vld [vmem:[%s1288_s7 + $0xf0] sm:$0xff] }
  0x36   : > { %1129 = vmatpush.msrb.mxu3 %v802_v42 }
  0x3b   : > { %1065 = vmatmul.msk.f32.gmra.mxu0 %vm304_vm0, %v1316_v9  ;;  %1083 = vmatmul.msk.f32.gmra.mxu3 %vm304_vm0, %v251_v34 }
  0x43   : > { %1066 = vmatmul.msk.f32.gmra.mxu0 %vm304_vm0, %v1321_v10  ;;  %1084 = vmatmul.msk.f32.gmra.mxu3 %vm304_vm0, %v252_v40 }
  0x4b   : > { %1067 = vmatmul.msk.f32.gmra.mxu0 %vm304_vm0, %v1326_v11  ;;  %1085 = vmatmul.msk.f32.gmra.mxu3 %vm304_vm0, %v253_v44 }
  0x53   : > { %1068 = vmatmul.msk.f32.gmra.mxu0 %vm304_vm0, %v236_v12  ;;  %1086 = vmatmul.msk.f32.gmra.mxu3 %vm304_vm0, %v254_v51 }
  0x5b   : > { %1069 = vmatmul.msk.f32.gmra.mxu0 %vm304_vm0, %v237_v14  ;;  %1087 = vmatmul.msk.f32.gmra.mxu3 %vm304_vm0, %v255_v60 }
  0x63   : > { %1070 = vmatmul.msk.f32.gmra.mxu0 %vm304_vm0, %v238_v16  ;;  %1088 = vmatmul.msk.f32.gmra.mxu3 %vm304_vm0, %v256_v15 }
  0x6b   : > { %1071 = vmatmul.msk.f32.gmra.mxu0 %vm304_vm0, %v239_v18  ;;  %1089 = vmatmul.msk.f32.gmra.mxu3 %vm304_vm0, %v1439_v27 }
  0x73   : > { %1072 = vmatmul.msk.f32.gmra.mxu0 %vm304_vm0, %v240_v23  ;;  %1090 = vmatmul.msk.f32.gmra.mxu3 %vm304_vm0, %v1445_v39 }
  0x7b   : > { %1073 = vmatmul.msk.f32.gmra.mxu0 %vm304_vm0, %v241_v29 }
  0x83   : > { %1074 = vmatmul.msk.f32.gmra.mxu0 %vm304_vm0, %v242_v35 }
  0x8b   : > { %1075 = vmatmul.msk.f32.gmra.mxu0 %vm304_vm0, %v1403_v41 }
  0x90   : > { %v418_v45 = vpop.f32.mrf.mxu0 }
  0x91   : > { %v419_v47 = vadd.f32 %v1414_v43, %v418_v45 }
  0x93   : > { %v514_v48 = vmul.f32 %v419_v47, %v419_v47  ;;  %1076 = vmatmul.msk.f32.gmra.mxu0 %vm304_vm0, %v1418_v46 }
  0x95   : > { %v546_v49 = vmul.f32 %v514_v48, %v419_v47 }
  0x97   : > { %v578_v50 = vmul.f32 0.044715, %v546_v49 }
  0x98   : > { %v421_v52 = vpop.f32.mrf.mxu0 }
  0x99   : > { %v422_v54 = vadd.f32 %v1414_v43, %v421_v52  ;;  %v610_v55 = vadd.f32 %v578_v50, %v419_v47 }
  0x9b   : > { %v515_v56 = vmul.f32 %v422_v54, %v422_v54  ;;  %1077 = vmatmul.msk.f32.gmra.mxu0 %vm304_vm0, %v1426_v53  ;;  %v642_v57 = vmul.f32 0.7978846, %v610_v55  ;;  %v1451_v55 = vld [vmem:[%s1288_s7 + $0xf8] sm:$0xff] }
  0x9c   : > { %1091 = vmatmul.msk.f32.gmra.mxu3 %vm304_vm0, %v1451_v55 }
  0x9d   : > { %v547_v58 = vmul.f32 %v515_v56, %v422_v54  ;;  %1140 = vtanh.f32 %v642_v57 }
  0x9f   : > { %v579_v59 = vmul.f32 0.044715, %v547_v58 }
  0xa0   : > { %v424_v61 = vpop.f32.mrf.mxu0 }
  0xa1   : > { %v425_v62 = vadd.f32 %v1414_v43, %v424_v61  ;;  %v611_v63 = vadd.f32 %v579_v59, %v422_v54 }
  0xa3   : > { %v1141_v0 = vpop.eup %1140  ;;  %v516_v1 = vmul.f32 %v425_v62, %v425_v62  ;;  %v643_v2 = vmul.f32 0.7978846, %v611_v63 }
  0xa4   : > { %v706_v3 = vadd.f32 1.0, %v1141_v0 }
  0xa5   : > { %v548_v12 = vmul.f32 %v516_v1, %v425_v62  ;;  %1142 = vtanh.f32 %v643_v2 }
  0xa6   : > { %v738_v13 = vmul.f32 0.5, %v706_v3 }
  0xa7   : > { %v580_v14 = vmul.f32 0.044715, %v548_v12 }
  0xa8   : > { %v427_v16 = vpop.f32.mrf.mxu0  ;;  %v770_v17 = vmul.f32 %v738_v13, %v419_v47 }
  0xa9   : > { %v428_v18 = vadd.f32 %v1414_v43, %v427_v16  ;;  %v612_v19 = vadd.f32 %v580_v14, %v425_v62 }
  0xaa   : > { %834 = vmatmul.f32.vlgmr.msra.gmra.mxu1 %v770_v17 }
  0xab   : > { %v1143_v20 = vpop.eup %1142  ;;  %v517_v21 = vmul.f32 %v428_v18, %v428_v18  ;;  %v644_v22 = vmul.f32 0.7978846, %v612_v19 }
  0xac   : > { %v707_v23 = vadd.f32 1.0, %v1143_v20 }
  0xad   : > { %v549_v24 = vmul.f32 %v517_v21, %v428_v18  ;;  %1144 = vtanh.f32 %v644_v22 }
  0xae   : > { %v739_v25 = vmul.f32 0.5, %v707_v23 }
  0xaf   : > { %v581_v26 = vmul.f32 0.044715, %v549_v24 }
  0xb0   : > { %v430_v28 = vpop.f32.mrf.mxu0  ;;  %v771_v29 = vmul.f32 %v739_v25, %v422_v54 }
  0xb1   : > { %v431_v30 = vadd.f32 %v1414_v43, %v430_v28  ;;  %v613_v31 = vadd.f32 %v581_v26, %v428_v18 }
  0xb2   : > { %837 = vmatmul.f32.gmra.mxu1 %v771_v29 }
  0xb3   : > { %v1145_v32 = vpop.eup %1144  ;;  %v518_v33 = vmul.f32 %v431_v30, %v431_v30  ;;  %v645_v34 = vmul.f32 0.7978846, %v613_v31 }
  0xb4   : > { %v708_v35 = vadd.f32 1.0, %v1145_v32 }
  0xb5   : > { %v550_v36 = vmul.f32 %v518_v33, %v431_v30  ;;  %1146 = vtanh.f32 %v645_v34 }
  0xb6   : > { %v740_v37 = vmul.f32 0.5, %v708_v35 }
  0xb7   : > { %v582_v38 = vmul.f32 0.044715, %v550_v36 }
  0xb8   : > { %v433_v40 = vpop.f32.mrf.mxu0  ;;  %v772_v42 = vmul.f32 %v740_v37, %v425_v62 }
  0xb9   : > { %v434_v44 = vadd.f32 %v1414_v43, %v433_v40  ;;  %v614_v45 = vadd.f32 %v582_v38, %v431_v30 }
  0xba   : > { %840 = vmatmul.f32.gmra.mxu1 %v772_v42 }
  0xbb   : > { %v1147_v47 = vpop.eup %1146  ;;  %v519_v48 = vmul.f32 %v434_v44, %v434_v44  ;;  %v646_v49 = vmul.f32 0.7978846, %v614_v45 }
  0xbc   : > { %v709_v50 = vadd.f32 1.0, %v1147_v47 }
  0xbd   : > { %v551_v51 = vmul.f32 %v519_v48, %v434_v44  ;;  %1148 = vtanh.f32 %v646_v49 }
  0xbe   : > { %v741_v52 = vmul.f32 0.5, %v709_v50 }
  0xbf   : > { %v583_v54 = vmul.f32 0.044715, %v551_v51 }
  0xc0   : > { %v436_v56 = vpop.f32.mrf.mxu0  ;;  %v773_v57 = vmul.f32 %v741_v52, %v428_v18 }
  0xc1   : > { %v437_v58 = vadd.f32 %v1414_v43, %v436_v56  ;;  %v615_v59 = vadd.f32 %v583_v54, %v434_v44 }
  0xc2   : > { %843 = vmatmul.f32.gmra.mxu1 %v773_v57 }
  0xc3   : > { %v1149_v60 = vpop.eup %1148  ;;  %v520_v61 = vmul.f32 %v437_v58, %v437_v58  ;;  %v647_v62 = vmul.f32 0.7978846, %v615_v59 }
  0xc4   : > { %v710_v63 = vadd.f32 1.0, %v1149_v60 }
  0xc5   : > { %v552_v0 = vmul.f32 %v520_v61, %v437_v58  ;;  %1150 = vtanh.f32 %v647_v62 }
  0xc6   : > { %v742_v1 = vmul.f32 0.5, %v710_v63 }
  0xc7   : > { %v584_v2 = vmul.f32 0.044715, %v552_v0 }
  0xc8   : > { %v439_v3 = vpop.f32.mrf.mxu0  ;;  %v774_v12 = vmul.f32 %v742_v1, %v431_v30 }
  0xc9   : > { %v440_v13 = vadd.f32 %v1414_v43, %v439_v3  ;;  %v616_v14 = vadd.f32 %v584_v2, %v437_v58 }
  0xca   : > { %846 = vmatmul.f32.gmra.mxu1 %v774_v12 }
  0xcb   : > { %v1151_v15 = vpop.eup %1150  ;;  %v521_v16 = vmul.f32 %v440_v13, %v440_v13  ;;  %v648_v17 = vmul.f32 0.7978846, %v616_v14 }
  0xcc   : > { %v711_v18 = vadd.f32 1.0, %v1151_v15 }
  0xcd   : > { %v553_v19 = vmul.f32 %v521_v16, %v440_v13  ;;  %1152 = vtanh.f32 %v648_v17 }
  0xce   : > { %v743_v20 = vmul.f32 0.5, %v711_v18 }
  0xcf   : > { %v585_v21 = vmul.f32 0.044715, %v553_v19 }
  0xd0   : > { %v442_v22 = vpop.f32.mrf.mxu0  ;;  %v775_v23 = vmul.f32 %v743_v20, %v434_v44  ;;  %v1459_v44 = vpop.f32.mrf.mxu3 }
  0xd1   : > { %v443_v24 = vadd.f32 %v1414_v43, %v442_v22  ;;  %v617_v25 = vadd.f32 %v585_v21, %v440_v13 }
  0xd2   : > { %849 = vmatmul.f32.gmra.mxu1 %v775_v23 }
  0xd3   : > { %v1153_v26 = vpop.eup %1152  ;;  %v522_v28 = vmul.f32 %v443_v24, %v443_v24  ;;  %v649_v29 = vmul.f32 0.7978846, %v617_v25 }
  0xd4   : > { %v712_v30 = vadd.f32 1.0, %v1153_v26 }
  0xd5   : > { %v554_v31 = vmul.f32 %v522_v28, %v443_v24  ;;  %1154 = vtanh.f32 %v649_v29 }
  0xd6   : > { %v744_v32 = vmul.f32 0.5, %v712_v30 }
  0xd7   : > { %v586_v33 = vmul.f32 0.044715, %v554_v31 }
  0xd8   : > { %v445_v34 = vpop.f32.mrf.mxu0  ;;  %v776_v35 = vmul.f32 %v744_v32, %v437_v58  ;;  %v1462_v59 = vpop.f32.mrf.mxu3 }
  0xd9   : > { %v446_v36 = vadd.f32 %v1414_v43, %v445_v34  ;;  %v618_v37 = vadd.f32 %v586_v33, %v443_v24 }
  0xda   : > { %852 = vmatmul.f32.gmra.mxu1 %v776_v35 }
  0xdb   : > { %v1155_v38 = vpop.eup %1154  ;;  %v523_v40 = vmul.f32 %v446_v36, %v446_v36  ;;  %v650_v42 = vmul.f32 0.7978846, %v618_v37 }
  0xdc   : > { %v713_v45 = vadd.f32 1.0, %v1155_v38 }
  0xdd   : > { %v555_v47 = vmul.f32 %v523_v40, %v446_v36  ;;  %1156 = vtanh.f32 %v650_v42 }
  0xde   : > { %v745_v48 = vmul.f32 0.5, %v713_v45 }
  0xdf   : > { %v587_v49 = vmul.f32 0.044715, %v555_v47 }
  0xe0   : > { %v448_v50 = vpop.f32.mrf.mxu0  ;;  %v777_v51 = vmul.f32 %v745_v48, %v440_v13  ;;  %v1465_v15 = vpop.f32.mrf.mxu3 }
  0xe1   : > { %v449_v52 = vadd.f32 %v1414_v43, %v448_v50  ;;  %v619_v54 = vadd.f32 %v587_v49, %v446_v36 }
  0xe2   : > { %855 = vmatmul.f32.gmra.mxu1 %v777_v51 }
  0xe3   : > { %v1157_v56 = vpop.eup %1156  ;;  %v524_v57 = vmul.f32 %v449_v52, %v449_v52  ;;  %v651_v58 = vmul.f32 0.7978846, %v619_v54 }
  0xe4   : > { %v714_v60 = vadd.f32 1.0, %v1157_v56 }
  0xe5   : > { %v556_v61 = vmul.f32 %v524_v57, %v449_v52  ;;  %1158 = vtanh.f32 %v651_v58 }
  0xe6   : > { %v746_v62 = vmul.f32 0.5, %v714_v60 }
  0xe7   : > { %v588_v63 = vmul.f32 0.044715, %v556_v61 }
  0xe8   : > { %v451_v0 = vpop.f32.mrf.mxu0  ;;  %v778_v1 = vmul.f32 %v746_v62, %v443_v24  ;;  %v1468_v28 = vpop.f32.mrf.mxu3 }
  0xe9   : > { %v452_v2 = vadd.f32 %v1414_v43, %v451_v0  ;;  %v620_v3 = vadd.f32 %v588_v63, %v449_v52 }
  0xea   : > { %858 = vmatmul.f32.gmra.mxu1 %v778_v1 }
  0xeb   : > { %v1159_v12 = vpop.eup %1158  ;;  %v525_v13 = vmul.f32 %v452_v2, %v452_v2  ;;  %v652_v14 = vmul.f32 0.7978846, %v620_v3 }
  0xec   : > { %v715_v16 = vadd.f32 1.0, %v1159_v12 }
  0xed   : > { %v557_v17 = vmul.f32 %v525_v13, %v452_v2  ;;  %1160 = vtanh.f32 %v652_v14 }
  0xee   : > { %v747_v18 = vmul.f32 0.5, %v715_v16 }
  0xef   : > { %v589_v19 = vmul.f32 0.044715, %v557_v17 }
  0xf0   : > { %v454_v20 = vpop.f32.mrf.mxu0  ;;  %v779_v21 = vmul.f32 %v747_v18, %v446_v36  ;;  %v1471_v42 = vpop.f32.mrf.mxu3 }
  0xf1   : > { %v455_v22 = vadd.f32 %v1414_v43, %v454_v20  ;;  %v621_v23 = vadd.f32 %v589_v19, %v452_v2 }
  0xf2   : > { %861 = vmatmul.f32.gmra.mxu1 %v779_v21  ;;  %v1481_v21 = vadd.f32 %v1414_v43, %v1459_v44 }
  0xf3   : > { %v1161_v24 = vpop.eup %1160  ;;  %v526_v25 = vmul.f32 %v455_v22, %v455_v22  ;;  %v653_v26 = vmul.f32 0.7978846, %v621_v23 }
  0xf4   : > { %v716_v29 = vadd.f32 1.0, %v1161_v24 }
  0xf5   : > { %v558_v30 = vmul.f32 %v526_v25, %v455_v22  ;;  %1162 = vtanh.f32 %v653_v26 }
  0xf6   : > { %v748_v31 = vmul.f32 0.5, %v716_v29 }
  0xf7   : > { %v590_v32 = vmul.f32 0.044715, %v558_v30  ;;  %v532_v30 = vmul.f32 %v1481_v21, %v1481_v21 }
  0xf8   : > { %v457_v33 = vpop.f32.mrf.mxu0  ;;  %v780_v34 = vmul.f32 %v748_v31, %v449_v52  ;;  %v1474_v60 = vpop.f32.mrf.mxu3 }
  0xf9   : > { %v458_v35 = vadd.f32 %v1414_v43, %v457_v33  ;;  %v622_v37 = vadd.f32 %v590_v32, %v455_v22 }
  0xfa   : > { %864 = vmatmul.f32.gmra.mxu1 %v780_v34 }
  0xfb   : > { %v1163_v36 = vpop.eup %1162  ;;  %v527_v38 = vmul.f32 %v458_v35, %v458_v35  ;;  %v654_v40 = vmul.f32 0.7978846, %v622_v37 }
  0xfc   : > { %v717_v45 = vadd.f32 1.0, %v1163_v36  ;;  %v564_v36 = vmul.f32 %v532_v30, %v1481_v21 }
  0xfd   : > { %v559_v47 = vmul.f32 %v527_v38, %v458_v35  ;;  %1164 = vtanh.f32 %v654_v40 }
  0xfe   : > { %v749_v48 = vmul.f32 0.5, %v717_v45 }
  0xff   : > { %v591_v49 = vmul.f32 0.044715, %v559_v47 }
 0x100   : > { %v460_v50 = vpop.f32.mrf.mxu0  ;;  %v781_v51 = vmul.f32 %v749_v48, %v452_v2  ;;  %v1477_v17 = vpop.f32.mrf.mxu3 }
 0x101   : > { %v461_v54 = vadd.f32 %v1414_v43, %v460_v50  ;;  %v623_v56 = vadd.f32 %v591_v49, %v458_v35 }
 0x102   : > { %867 = vmatmul.f32.gmra.mxu1 %v781_v51 }
 0x103   : > { %v1165_v52 = vpop.eup %1164  ;;  %v528_v57 = vmul.f32 %v461_v54, %v461_v54  ;;  %v655_v58 = vmul.f32 0.7978846, %v623_v56 }
 0x104   : > { %v718_v61 = vadd.f32 1.0, %v1165_v52  ;;  %v596_v52 = vmul.f32 0.044715, %v564_v36 }
 0x105   : > { %v560_v62 = vmul.f32 %v528_v57, %v461_v54  ;;  %1166 = vtanh.f32 %v655_v58 }
 0x106   : > { %v750_v63 = vmul.f32 0.5, %v718_v61 }
 0x107   : > { %v592_v0 = vmul.f32 0.044715, %v560_v62 }
 0x108   : > { %v463_v1 = vpop.f32.mrf.mxu0  ;;  %v782_v3 = vmul.f32 %v750_v63, %v455_v22  ;;  %v1486_v33 = vpop.f32.mrf.mxu3 }
 0x109   : > { %v464_v12 = vadd.f32 %v1414_v43, %v463_v1  ;;  %v624_v13 = vadd.f32 %v592_v0, %v461_v54  ;;  %v628_v0 = vadd.f32 %v596_v52, %v1481_v21 }
 0x10a   : > { %870 = vmatmul.f32.gmra.mxu1 %v782_v3  ;;  %v1507_v3 = vld [vmem:[%s1762_s4] ss:$0 sm:$0xff] }
 0x10b   : > { %v1167_v2 = vpop.eup %1166  ;;  %v529_v14 = vmul.f32 %v464_v12, %v464_v12  ;;  %v656_v16 = vmul.f32 0.7978846, %v624_v13 }
 0x10c   : > { %v719_v18 = vadd.f32 1.0, %v1167_v2 }
 0x10d   : > { %v561_v19 = vmul.f32 %v529_v14, %v464_v12  ;;  %1168 = vtanh.f32 %v656_v16  ;;  %v660_v16 = vmul.f32 0.7978846, %v628_v0 }
 0x10e   : > { %v751_v20 = vmul.f32 0.5, %v719_v18 }
 0x10f   : > { %v593_v23 = vmul.f32 0.044715, %v561_v19 }
 0x110   : > { %v466_v24 = vpop.f32.mrf.mxu0  ;;  %v783_v22 = vmul.f32 %v751_v20, %v458_v35  ;;  %v1491_v35 = vadd.f32 %v1414_v43, %v1462_v59  ;;  %v1496_v57 = vpop.f32.mrf.mxu3  ;;  %v1500_v59 = vadd.f32 %v1414_v43, %v1465_v15  ;;  %v264_v20 = vadd.f32 %v1507_v3, %v1291_v4 }
 0x111   : > { %v467_v25 = vadd.f32 %v1414_v43, %v466_v24  ;;  %v625_v26 = vadd.f32 %v593_v23, %v464_v12 }
 0x112   : > { %873 = vmatmul.f32.gmra.mxu1 %v783_v22  ;;  %v533_v50 = vmul.f32 %v1491_v35, %v1491_v35  ;;  %v534_v2 = vmul.f32 %v1500_v59, %v1500_v59  ;;  %v1525_v22 = vadd.f32 %v1414_v43, %v1468_v28  ;;  %v265_v28 = vadd.f32 %v1507_v3, %v1296_v5 }
 0x113   : > { %v1169_v29 = vpop.eup %1168  ;;  %v530_v31 = vmul.f32 %v467_v25, %v467_v25  ;;  %v657_v32 = vmul.f32 0.7978846, %v625_v26 }
 0x114   : > { %v720_v34 = vadd.f32 1.0, %v1169_v29  ;;  %v565_v62 = vmul.f32 %v533_v50, %v1491_v35  ;;  %v566_v23 = vmul.f32 %v534_v2, %v1500_v59 }
 0x115   : > { %v562_v37 = vmul.f32 %v530_v31, %v467_v25  ;;  %1170 = vtanh.f32 %v657_v32 }
 0x116   : > { %v752_v44 = vmul.f32 0.5, %v720_v34  ;;  %v597_v18 = vmul.f32 0.044715, %v565_v62  ;;  %v598_v31 = vmul.f32 0.044715, %v566_v23  ;;  %v535_v34 = vmul.f32 %v1525_v22, %v1525_v22 }
 0x117   : > { %v594_v38 = vmul.f32 0.044715, %v562_v37 }
 0x118   : > { %v469_v40 = vpop.f32.mrf.mxu0  ;;  %v784_v45 = vmul.f32 %v752_v44, %v461_v54  ;;  %v1511_v19 = vpop.f32.mrf.mxu3  ;;  %v629_v4 = vadd.f32 %v597_v18, %v1491_v35 }
 0x119   : > { %v470_v47 = vadd.f32 %v1414_v43, %v469_v40  ;;  %v626_v48 = vadd.f32 %v594_v38, %v467_v25 }
 0x11a   : > { %876 = vmatmul.f32.gmra.mxu1 %v784_v45  ;;  %v661_v37 = vmul.f32 0.7978846, %v629_v4  ;;  %v567_v45 = vmul.f32 %v535_v34, %v1525_v22 }
 0x11b   : > { %v1171_v49 = vpop.eup %1170  ;;  %v531_v51 = vmul.f32 %v470_v47, %v470_v47  ;;  %v658_v56 = vmul.f32 0.7978846, %v626_v48  ;;  %v1540_v48 = vadd.f32 %v1414_v43, %v1471_v42  ;;  %v266_v42 = vadd.f32 %v1507_v3, %v1301_v6 }
 0x11c   : > { %v721_v58 = vadd.f32 1.0, %v1171_v49 }
 0x11d   : > { %v563_v61 = vmul.f32 %v531_v51, %v470_v47  ;;  %1172 = vtanh.f32 %v658_v56  ;;  %v536_v52 = vmul.f32 %v1540_v48, %v1540_v48 }
 0x11e   : > { %v753_v54 = vmul.f32 0.5, %v721_v58  ;;  %v599_v58 = vmul.f32 0.044715, %v567_v45 }
 0x11f   : > { %v595_v63 = vmul.f32 0.044715, %v563_v61 }
 0x120   : > { %v785_v1 = vmul.f32 %v753_v54, %v464_v12  ;;  %v1532_v44 = vpop.f32.mrf.mxu3 }
 0x121   : > { %v627_v13 = vadd.f32 %v595_v63, %v470_v47  ;;  %v1553_v63 = vadd.f32 %v1414_v43, %v1474_v60  ;;  %v267_v60 = vadd.f32 %v1507_v3, %v1306_v7 }
 0x122   : > { %879 = vmatmul.f32.vlgmr.msra.gmra.mxu2 %v785_v1  ;;  %v631_v1 = vadd.f32 %v599_v58, %v1525_v22 }
 0x123   : > { %v1173_v15 = vpop.eup %1172  ;;  %v659_v14 = vmul.f32 0.7978846, %v627_v13  ;;  %v537_v6 = vmul.f32 %v1553_v63, %v1553_v63 }
 0x124   : > { %v722_v12 = vadd.f32 1.0, %v1173_v15 }
 0x125   : > { %1174 = vtanh.f32 %v659_v14  ;;  %v663_v14 = vmul.f32 0.7978846, %v631_v1 }
 0x126   : > { %v754_v24 = vmul.f32 0.5, %v722_v12  ;;  %1176 = vtanh.f32 %v660_v16 }
 0x127   : > { %v835_v26 = vpop.f32.mrf.mxu1  ;;  %1178 = vtanh.f32 %v661_v37 }
 0x128   : > { %v931_v29 = vadd.f32 %v835_v26, %v264_v20  ;;  %v786_v30 = vmul.f32 %v754_v24, %v467_v25  ;;  %v630_v25 = vadd.f32 %v598_v31, %v1500_v59  ;;  %v1546_v61 = vpop.f32.mrf.mxu3  ;;  %v569_v26 = vmul.f32 %v537_v6, %v1553_v63 }
 0x12a   : > { %963 = vst.msk [vmem:[%s1521_s27] sm:$0xff] %vm304_vm0, %v931_v29  ;;  %882 = vmatmul.f32.gmra.mxu2 %v786_v30  ;;  %v662_v5 = vmul.f32 0.7978846, %v630_v25 }
 0x12b   : > { %v1175_v32 = vpop.eup %1174 }
 0x12c   : > { %v723_v36 = vadd.f32 1.0, %v1175_v32  ;;  %v1177_v38 = vpop.eup %1176  ;;  %1180 = vtanh.f32 %v662_v5 }
 0x12d   : > { %v724_v56 = vadd.f32 1.0, %v1177_v38  ;;  %v1179_v62 = vpop.eup %1178  ;;  %1182 = vtanh.f32 %v663_v14 }
 0x12e   : > { %v755_v40 = vmul.f32 0.5, %v723_v36  ;;  %v725_v15 = vadd.f32 1.0, %v1179_v62  ;;  %v601_v36 = vmul.f32 0.044715, %v569_v26 }
 0x12f   : > { %v838_v49 = vpop.f32.mrf.mxu1  ;;  %v756_v54 = vmul.f32 0.5, %v724_v56  ;;  %v1591_v56 = vadd.f32 %v1414_v43, %v1486_v33 }
 0x130   : > { %v932_v50 = vadd.f32 %v838_v49, %v265_v28  ;;  %v787_v51 = vmul.f32 %v755_v40, %v470_v47  ;;  %v568_v47 = vmul.f32 %v536_v52, %v1540_v48  ;;  %v508_v18 = vpop.f32.mrf.mxu3  ;;  %v757_v12 = vmul.f32 0.5, %v725_v15 }
 0x131   : > { %v788_v2 = vmul.f32 %v756_v54, %v1481_v21  ;;  %v1564_v23 = vadd.f32 %v1414_v43, %v508_v18  ;;  %v1568_v21 = vadd.f32 %v1414_v43, %v1477_v17  ;;  %v268_v40 = vadd.f32 %v1507_v3, %v1311_v8 }
 0x132   : > { %964 = vst.msk [vmem:[%s1521_s27 + $0x8] sm:$0xff] %vm304_vm0, %v932_v50  ;;  %885 = vmatmul.f32.gmra.mxu2 %v787_v51  ;;  %v600_v16 = vmul.f32 0.044715, %v568_v47  ;;  %v1181_v20 = vpop.eup %1180  ;;  %v789_v7 = vmul.f32 %v757_v12, %v1491_v35  ;;  %v633_v52 = vadd.f32 %v601_v36, %v1553_v63  ;;  %v539_v33 = vmul.f32 %v1591_v56, %v1591_v56 }
 0x133   : > { %v544_v24 = vmul.f32 %v1564_v23, %v1564_v23  ;;  %v726_v29 = vadd.f32 1.0, %v1181_v20  ;;  %v538_v34 = vmul.f32 %v1568_v21, %v1568_v21  ;;  %v1183_v45 = vpop.eup %1182  ;;  %v1607_v18 = vadd.f32 %v1414_v43, %v1496_v57 }
 0x134   : > { %v632_v30 = vadd.f32 %v600_v16, %v1540_v48  ;;  %v571_v16 = vmul.f32 %v539_v33, %v1591_v56  ;;  %v1204_v33 = vld [vmem:[%s1288_s7 + $0x40] sm:$0xff] }
 0x135   : > { %v576_v32 = vmul.f32 %v544_v24, %v1564_v23  ;;  %v758_v37 = vmul.f32 0.5, %v726_v29  ;;  %v570_v49 = vmul.f32 %v538_v34, %v1568_v21  ;;  %v540_v29 = vmul.f32 %v1607_v18, %v1607_v18 }
 0x136   : > { %v664_v28 = vmul.f32 0.7978846, %v632_v30  ;;  %v603_v30 = vmul.f32 0.044715, %v571_v16 }
 0x137   : > { %v841_v0 = vpop.f32.mrf.mxu1  ;;  %v608_v17 = vmul.f32 0.044715, %v576_v32  ;;  %v790_v8 = vmul.f32 %v758_v37, %v1500_v59  ;;  %v602_v62 = vmul.f32 0.044715, %v570_v49  ;;  %v269_v59 = vadd.f32 %v1507_v3, %v1316_v9 }
 0x138   : > { %v933_v13 = vadd.f32 %v841_v0, %v266_v42  ;;  %v511_v38 = vpop.f32.mrf.mxu3  ;;  %1184 = vtanh.f32 %v664_v28  ;;  %v727_v42 = vadd.f32 1.0, %v1183_v45  ;;  %v665_v0 = vmul.f32 0.7978846, %v633_v52 }
 0x139   : > { %v640_v25 = vadd.f32 %v608_v17, %v1564_v23  ;;  %v1584_v35 = vadd.f32 %v1414_v43, %v511_v38  ;;  %v634_v6 = vadd.f32 %v602_v62, %v1568_v21  ;;  %v572_v34 = vmul.f32 %v540_v29, %v1607_v18 }
 0x13a   : > { %965 = vst.msk [vmem:[%s1521_s27 + $0x10] sm:$0xff] %vm304_vm0, %v933_v13  ;;  %888 = vmatmul.f32.gmra.mxu2 %v788_v2  ;;  %v759_v1 = vmul.f32 0.5, %v727_v42  ;;  %v1620_v17 = vadd.f32 %v1414_v43, %v1511_v19  ;;  %v635_v28 = vadd.f32 %v603_v30, %v1591_v56 }
 0x13b   : > { %v545_v50 = vmul.f32 %v1584_v35, %v1584_v35  ;;  %v672_v51 = vmul.f32 0.7978846, %v640_v25  ;;  %v604_v49 = vmul.f32 0.044715, %v572_v34 }
 0x13c   : > { %v791_v9 = vmul.f32 %v759_v1, %v1525_v22  ;;  %v541_v25 = vmul.f32 %v1620_v17, %v1620_v17  ;;  %v667_v45 = vmul.f32 0.7978846, %v635_v28 }
 0x13d   : > { %v577_v54 = vmul.f32 %v545_v50, %v1584_v35  ;;  %1186 = vtanh.f32 %v672_v51  ;;  %v271_v51 = vadd.f32 %v1507_v3, %v1326_v11 }
 0x13e   : > { %v1185_v2 = vpop.eup %1184  ;;  %1188 = vtanh.f32 %v665_v0 }
 0x13f   : > { %v844_v4 = vpop.f32.mrf.mxu1  ;;  %v609_v47 = vmul.f32 0.044715, %v577_v54  ;;  %v728_v24 = vadd.f32 1.0, %v1185_v2 }
 0x140   : > { %v934_v31 = vadd.f32 %v844_v4, %v267_v60  ;;  %v666_v4 = vmul.f32 0.7978846, %v634_v6 }
 0x141   : > { %v641_v13 = vadd.f32 %v609_v47, %v1584_v35 }
 0x142   : > { %966 = vst.msk [vmem:[%s1521_s27 + $0x18] sm:$0xff] %vm304_vm0, %v934_v31  ;;  %891 = vmatmul.f32.gmra.mxu2 %v789_v7  ;;  %v270_v31 = vadd.f32 %v1507_v3, %v1321_v10  ;;  %v760_v7 = vmul.f32 0.5, %v728_v24 }
 0x143   : > { %v1187_v15 = vpop.eup %1186  ;;  %v673_v14 = vmul.f32 0.7978846, %v641_v13 }
 0x144   : > { %v736_v60 = vadd.f32 1.0, %v1187_v15  ;;  %v1189_v32 = vpop.eup %1188  ;;  %v792_v38 = vmul.f32 %v760_v7, %v1540_v48  ;;  %v573_v48 = vmul.f32 %v541_v25, %v1620_v17  ;;  %v1206_v7 = vld [vmem:[%s1288_s7 + $0x50] sm:$0xff] }
 0x145   : > { %1190 = vtanh.f32 %v673_v14 }
 0x146   : > { %v768_v26 = vmul.f32 0.5, %v736_v60  ;;  %1192 = vtanh.f32 %v666_v4  ;;  %v605_v47 = vmul.f32 0.044715, %v573_v48 }
 0x147   : > { %v847_v5 = vpop.f32.mrf.mxu1  ;;  %1194 = vtanh.f32 %v667_v45 }
 0x148   : > { %v935_v58 = vadd.f32 %v847_v5, %v268_v40  ;;  %v800_v57 = vmul.f32 %v768_v26, %v1564_v23  ;;  %v729_v40 = vadd.f32 1.0, %v1189_v32  ;;  %v637_v2 = vadd.f32 %v605_v47, %v1620_v17 }
 0x149   : > { %v274_v32 = vadd.f32 %v1206_v7, %v1507_v3 }
 0x14a   : > { %967 = vst.msk [vmem:[%s1521_s27 + $0x20] sm:$0xff] %vm304_vm0, %v935_v58  ;;  %894 = vmatmul.f32.gmra.mxu2 %v790_v8  ;;  %924 = vmatmul.f32.vlgmr.msrb.gmra.mxu3 %v800_v57  ;;  %v761_v5 = vmul.f32 0.5, %v729_v40  ;;  %v1634_v8 = vadd.f32 %v1414_v43, %v1532_v44  ;;  %v636_v58 = vadd.f32 %v604_v49, %v1607_v18  ;;  %v1207_v40 = vld [vmem:[%s1288_s7 + $0x58] sm:$0xff] }
 0x14b   : > { %v1191_v22 = vpop.eup %1190  ;;  %v272_v44 = vadd.f32 %v1204_v33, %v1507_v3 }
 0x14c   : > { %v737_v36 = vadd.f32 1.0, %v1191_v22  ;;  %v1193_v50 = vpop.eup %1192  ;;  %v542_v11 = vmul.f32 %v1634_v8, %v1634_v8  ;;  %v668_v62 = vmul.f32 0.7978846, %v636_v58 }
 0x14d   : > { %v730_v54 = vadd.f32 1.0, %v1193_v50 }
 0x14e   : > { %v769_v10 = vmul.f32 0.5, %v737_v36  ;;  %v574_v1 = vmul.f32 %v542_v11, %v1634_v8  ;;  %1196 = vtanh.f32 %v668_v62 }
 0x14f   : > { %v850_v20 = vpop.f32.mrf.mxu1  ;;  %v762_v0 = vmul.f32 0.5, %v730_v54 }
 0x150   : > { %v936_v12 = vadd.f32 %v850_v20, %v269_v59  ;;  %v801_v19 = vmul.f32 %v769_v10, %v1584_v35  ;;  %v793_v35 = vmul.f32 %v761_v5, %v1553_v63  ;;  %v1195_v59 = vpop.eup %1194  ;;  %v1647_v63 = vadd.f32 %v1414_v43, %v1546_v61  ;;  %v1205_v43 = vld [vmem:[%s1288_s7 + $0x48] sm:$0xff] }
 0x151   : > { %v794_v6 = vmul.f32 %v762_v0, %v1568_v21  ;;  %v731_v14 = vadd.f32 1.0, %v1195_v59  ;;  %v669_v20 = vmul.f32 0.7978846, %v637_v2  ;;  %v606_v60 = vmul.f32 0.044715, %v574_v1  ;;  %v1210_v0 = vld [vmem:[%s1288_s7 + $0x70] sm:$0xff] }
 0x152   : > { %968 = vst.msk [vmem:[%s1521_s27 + $0x28] sm:$0xff] %vm304_vm0, %v936_v12  ;;  %897 = vmatmul.f32.gmra.mxu2 %v791_v9  ;;  %927 = vmatmul.f32.gmra.mxu3 %v801_v19  ;;  %v543_v16 = vmul.f32 %v1647_v63, %v1647_v63  ;;  %v273_v61 = vadd.f32 %v1205_v43, %v1507_v3 }
 0x153   : > { %v763_v12 = vmul.f32 0.5, %v731_v14  ;;  %1198 = vtanh.f32 %v669_v20  ;;  %v638_v21 = vadd.f32 %v606_v60, %v1634_v8  ;;  %v275_v10 = vadd.f32 %v1207_v40, %v1507_v3  ;;  %v1211_v60 = vld [vmem:[%s1288_s7 + $0x90] sm:$0xff]  ;;  %v1216_v40 = vld [vmem:[%s1288_s7 + $0xb8] sm:$0xff] }
 0x154   : > { %v1197_v9 = vpop.eup %1196  ;;  %v575_v24 = vmul.f32 %v543_v16, %v1647_v63  ;;  %v281_v16 = vadd.f32 %v1507_v3, %v1426_v53  ;;  %v282_v43 = vadd.f32 %v1211_v60, %v1507_v3 }
 0x155   : > { %v795_v29 = vmul.f32 %v763_v12, %v1591_v56  ;;  %v732_v30 = vadd.f32 1.0, %v1197_v9  ;;  %v670_v57 = vmul.f32 0.7978846, %v638_v21  ;;  %v1212_v12 = vld [vmem:[%s1288_s7 + $0x98] sm:$0xff] }
 0x156   : > { %v283_v9 = vadd.f32 %v1212_v12, %v1507_v3 }
 0x157   : > { %v853_v37 = vpop.f32.mrf.mxu1  ;;  %v764_v22 = vmul.f32 0.5, %v732_v30  ;;  %1200 = vtanh.f32 %v670_v57  ;;  %v1214_v30 = vld [vmem:[%s1288_s7 + $0xa8] sm:$0xff] }
 0x158   : > { %v937_v23 = vadd.f32 %v853_v37, %v270_v31  ;;  %v607_v31 = vmul.f32 0.044715, %v575_v24  ;;  %v285_v57 = vadd.f32 %v1214_v30, %v1507_v3 }
 0x159   : > { %v1199_v34 = vpop.eup %1198  ;;  %v796_v56 = vmul.f32 %v764_v22, %v1607_v18  ;;  %v1208_v18 = vld [vmem:[%s1288_s7 + $0x60] sm:$0xff] }
 0x15a   : > { %969 = vst.msk [vmem:[%s1521_s27 + $0x30] sm:$0xff] %vm304_vm0, %v937_v23  ;;  %900 = vmatmul.f32.gmra.mxu2 %v792_v38  ;;  %v639_v28 = vadd.f32 %v607_v31, %v1647_v63  ;;  %v733_v23 = vadd.f32 1.0, %v1199_v34  ;;  %v276_v5 = vadd.f32 %v1208_v18, %v1507_v3 }
 0x15c   : > { %v671_v38 = vmul.f32 0.7978846, %v639_v28  ;;  %v765_v25 = vmul.f32 0.5, %v733_v23  ;;  %v295_v23 = vadd.f32 %v1507_v3, %v1451_v55 }
 0x15d   : > { %v1201_v45 = vpop.eup %1200 }
 0x15e   : > { %1202 = vtanh.f32 %v671_v38  ;;  %v797_v50 = vmul.f32 %v765_v25, %v1620_v17  ;;  %v1209_v17 = vld [vmem:[%s1288_s7 + $0x68] sm:$0xff] }
 0x15f   : > { %v856_v52 = vpop.f32.mrf.mxu1  ;;  %v277_v11 = vadd.f32 %v1209_v17, %v1507_v3 }
 0x160   : > { %v938_v42 = vadd.f32 %v856_v52, %v271_v51  ;;  %v734_v51 = vadd.f32 1.0, %v1201_v45 }
 0x162   : > { %970 = vst.msk [vmem:[%s1521_s27 + $0x38] sm:$0xff] %vm304_vm0, %v938_v42  ;;  %903 = vmatmul.f32.gmra.mxu2 %v793_v35  ;;  %v766_v48 = vmul.f32 0.5, %v734_v51  ;;  %v1218_v51 = vld [vmem:[%s1288_s7 + $0xc8] sm:$0xff] }
 0x163   : > { %v289_v18 = vadd.f32 %v1218_v51, %v1507_v3 }
 0x164   : > { %v1203_v52 = vpop.eup %1202  ;;  %v798_v35 = vmul.f32 %v766_v48, %v1634_v8  ;;  %v278_v8 = vadd.f32 %v1210_v0, %v1507_v3 }
 0x165   : > { %v735_v54 = vadd.f32 1.0, %v1203_v52  ;;  %v1219_v52 = vld [vmem:[%s1288_s7 + $0xd0] sm:$0xff] }
 0x167   : > { %v859_v13 = vpop.f32.mrf.mxu1  ;;  %v767_v62 = vmul.f32 0.5, %v735_v54  ;;  %v1220_v54 = vld [vmem:[%s1288_s7 + $0xd8] sm:$0xff] }
 0x168   : > { %v939_v15 = vadd.f32 %v859_v13, %v272_v44  ;;  %v279_v13 = vadd.f32 %v1507_v3, %v1403_v41  ;;  %v291_v17 = vadd.f32 %v1220_v54, %v1507_v3 }
 0x169   : > { %v799_v44 = vmul.f32 %v767_v62, %v1647_v63  ;;  %v280_v63 = vadd.f32 %v1507_v3, %v1418_v46 }
 0x16a   : > { %971 = vst.msk [vmem:[%s1521_s27 + $0x40] sm:$0xff] %vm304_vm0, %v939_v15  ;;  %906 = vmatmul.f32.gmra.mxu2 %v794_v6 }
 0x16f   : > { %v862_v26 = vpop.f32.mrf.mxu1 }
 0x170   : > { %v940_v4 = vadd.f32 %v862_v26, %v273_v61  ;;  %v1213_v26 = vld [vmem:[%s1288_s7 + $0xa0] sm:$0xff] }
 0x171   : > { %v284_v21 = vadd.f32 %v1213_v26, %v1507_v3 }
 0x172   : > { %972 = vst.msk [vmem:[%s1521_s27 + $0x48] sm:$0xff] %vm304_vm0, %v940_v4  ;;  %909 = vmatmul.f32.gmra.mxu2 %v795_v29 }
 0x177   : > { %v865_v37 = vpop.f32.mrf.mxu1 }
 0x178   : > { %v941_v36 = vadd.f32 %v865_v37, %v274_v32  ;;  %v294_v32 = vadd.f32 %v1507_v3, %v1445_v39  ;;  %v1215_v37 = vld [vmem:[%s1288_s7 + $0xb0] sm:$0xff] }
 0x179   : > { %v286_v28 = vadd.f32 %v1215_v37, %v1507_v3 }
 0x17a   : > { %973 = vst.msk [vmem:[%s1521_s27 + $0x50] sm:$0xff] %vm304_vm0, %v941_v36  ;;  %912 = vmatmul.f32.gmra.mxu2 %v796_v56 }
 0x17f   : > { %v868_v49 = vpop.f32.mrf.mxu1 }
 0x180   : > { %v942_v19 = vadd.f32 %v868_v49, %v275_v10  ;;  %v287_v10 = vadd.f32 %v1216_v40, %v1507_v3  ;;  %v1217_v49 = vld [vmem:[%s1288_s7 + $0xc0] sm:$0xff] }
 0x181   : > { %v288_v55 = vadd.f32 %v1217_v49, %v1507_v3 }
 0x182   : > { %974 = vst.msk [vmem:[%s1521_s27 + $0x58] sm:$0xff] %vm304_vm0, %v942_v19  ;;  %915 = vmatmul.f32.gmra.mxu2 %v797_v50 }
 0x187   : > { %v871_v58 = vpop.f32.mrf.mxu1 }
 0x188   : > { %v943_v42 = vadd.f32 %v871_v58, %v276_v5  ;;  %v290_v58 = vadd.f32 %v1219_v52, %v1507_v3 }
 0x18a   : > { %975 = vst.msk [vmem:[%s1521_s27 + $0x60] sm:$0xff] %vm304_vm0, %v943_v42  ;;  %918 = vmatmul.f32.gmra.mxu2 %v798_v35 }
 0x18f   : > { %v874_v47 = vpop.f32.mrf.mxu1 }
 0x190   : > { %v944_v33 = vadd.f32 %v874_v47, %v277_v11  ;;  %v1221_v47 = vld [vmem:[%s1288_s7 + $0xe0] sm:$0xff] }
 0x192   : > { %976 = vst.msk [vmem:[%s1521_s27 + $0x68] sm:$0xff] %vm304_vm0, %v944_v33  ;;  %921 = vmatmul.f32.gmra.mxu2 %v799_v44  ;;  %v292_v33 = vadd.f32 %v1221_v47, %v1507_v3 }
 0x197   : > { %v877_v59 = vpop.f32.mrf.mxu1 }
 0x198   : > { %v945_v1 = vadd.f32 %v877_v59, %v278_v8  ;;  %v293_v8 = vadd.f32 %v1507_v3, %v1439_v27 }
 0x19a   : > { %977 = vst.msk [vmem:[%s1521_s27 + $0x70] sm:$0xff] %vm304_vm0, %v945_v1 }
 0x1a5   : > { %v880_v2 = vpop.f32.mrf.mxu2 }
 0x1a6   : > { %v946_v15 = vadd.f32 %v880_v2, %v279_v13 }
 0x1a8   : > { %978 = vst.msk [vmem:[%s1521_s27 + $0x78] sm:$0xff] %vm304_vm0, %v946_v15 }
 0x1ad   : > { %v883_v6 = vpop.f32.mrf.mxu2 }
 0x1ae   : > { %v947_v14 = vadd.f32 %v883_v6, %v280_v63 }
 0x1b0   : > { %979 = vst.msk [vmem:[%s1521_s27 + $0x80] sm:$0xff] %vm304_vm0, %v947_v14 }
 0x1b5   : > { %v886_v20 = vpop.f32.mrf.mxu2 }
 0x1b6   : > { %v948_v41 = vadd.f32 %v886_v20, %v281_v16 }
 0x1b8   : > { %980 = vst.msk [vmem:[%s1521_s27 + $0x88] sm:$0xff] %vm304_vm0, %v948_v41 }
 0x1bd   : > { %v889_v61 = vpop.f32.mrf.mxu2 }
 0x1be   : > { %v949_v46 = vadd.f32 %v889_v61, %v282_v43 }
 0x1c0   : > { %981 = vst.msk [vmem:[%s1521_s27 + $0x90] sm:$0xff] %vm304_vm0, %v949_v46 }
 0x1c5   : > { %v892_v24 = vpop.f32.mrf.mxu2 }
 0x1c6   : > { %v950_v53 = vadd.f32 %v892_v24, %v283_v9 }
 0x1c8   : > { %982 = vst.msk [vmem:[%s1521_s27 + $0x98] sm:$0xff] %vm304_vm0, %v950_v53 }
 0x1cd   : > { %v895_v4 = vpop.f32.mrf.mxu2  ;;  %v925_v22 = vpop.f32.mrf.mxu3 }
 0x1ce   : > { %v951_v29 = vadd.f32 %v895_v4, %v284_v21  ;;  %v961_v34 = vadd.f32 %v925_v22, %v294_v32 }
 0x1d0   : > { %983 = vst.msk [vmem:[%s1521_s27 + $0xa0] sm:$0xff] %vm304_vm0, %v951_v29 }
 0x1d1   : > { %993 = vst.msk [vmem:[%s1521_s27 + $0xf0] sm:$0xff] %vm304_vm0, %v961_v34 }
 0x1d5   : > { %v898_v31 = vpop.f32.mrf.mxu2  ;;  %v928_v39 = vpop.f32.mrf.mxu3 }
 0x1d6   : > { %v952_v7 = vadd.f32 %v898_v31, %v285_v57  ;;  %v962_v38 = vadd.f32 %v928_v39, %v295_v23 }
 0x1d8   : > { %984 = vst.msk [vmem:[%s1521_s27 + $0xa8] sm:$0xff] %vm304_vm0, %v952_v7 }
 0x1d9   : > { %994 = vst.msk [vmem:[%s1521_s27 + $0xf8] sm:$0xff] %vm304_vm0, %v962_v38 }
 0x1dd   : > { %v901_v36 = vpop.f32.mrf.mxu2 }
 0x1de   : > { %v953_v56 = vadd.f32 %v901_v36, %v286_v28 }
 0x1e0   : > { %985 = vst.msk [vmem:[%s1521_s27 + $0xb0] sm:$0xff] %vm304_vm0, %v953_v56 }
 0x1e5   : > { %v904_v25 = vpop.f32.mrf.mxu2 }
 0x1e6   : > { %v954_v45 = vadd.f32 %v904_v25, %v287_v10 }
 0x1e8   : > { %986 = vst.msk [vmem:[%s1521_s27 + $0xb8] sm:$0xff] %vm304_vm0, %v954_v45 }
 0x1ed   : > { %v907_v19 = vpop.f32.mrf.mxu2 }
 0x1ee   : > { %v955_v50 = vadd.f32 %v907_v19, %v288_v55 }
 0x1f0   : > { %987 = vst.msk [vmem:[%s1521_s27 + $0xc0] sm:$0xff] %vm304_vm0, %v955_v50 }
 0x1f5   : > { %v910_v5 = vpop.f32.mrf.mxu2 }
 0x1f6   : > { %v956_v48 = vadd.f32 %v910_v5, %v289_v18 }
 0x1f8   : > { %988 = vst.msk [vmem:[%s1521_s27 + $0xc8] sm:$0xff] %vm304_vm0, %v956_v48 }
 0x1fd   : > { %v913_v42 = vpop.f32.mrf.mxu2 }
 0x1fe   : > { %v957_v35 = vadd.f32 %v913_v42, %v290_v58 }
 0x200   : > { %989 = vst.msk [vmem:[%s1521_s27 + $0xd0] sm:$0xff] %vm304_vm0, %v957_v35 }
 0x205   : > { %v916_v11 = vpop.f32.mrf.mxu2 }
 0x206   : > { %v958_v62 = vadd.f32 %v916_v11, %v291_v17 }
 0x208   : > { %990 = vst.msk [vmem:[%s1521_s27 + $0xd8] sm:$0xff] %vm304_vm0, %v958_v62 }
 0x20d   : > { %v919_v44 = vpop.f32.mrf.mxu2 }
 0x20e   : > { %v959_v0 = vadd.f32 %v919_v44, %v292_v33 }
 0x210   : > { %991 = vst.msk [vmem:[%s1521_s27 + $0xe0] sm:$0xff] %vm304_vm0, %v959_v0 }
 0x215   : > { %v922_v59 = vpop.f32.mrf.mxu2 }
 0x216   : > { %v960_v1 = vadd.f32 %v922_v59, %v293_v8 }
 0x218   : > { %992 = vst.msk [vmem:[%s1521_s27 + $0xe8] sm:$0xff] %vm304_vm0, %v960_v1 }
 0x219 PF: > { %s15_s18 = sadd.s32 1, %s1228_s18  }
 0x21a   : > { %p12_p4 = scmp.ge.s32.totalorder %s15_s18, 6  }
 0x21c   :  { %14 = sbr.rel (!%p12_p4) target bundleno = 1 (0x1), region = 70 }

</bundles_post_ra>
